<compile_context>
chip_gen: v6e
topology: v6e:2x2x1
jax: 0.10.0
libtpu: 0.0.40
codegen_flags: <defaults>
</compile_context>

<pallas_src>
import jax
import jax.numpy as jnp
from jax.experimental import pallas as pl
from jax.experimental.pallas import tpu as pltpu

# Lane-aligned padded layer widths (multiples of 128).
H1 = 512       # layer_1 out: 400 -> 512
H2 = 384       # layer_2 out: 300 -> 384
OUT_PAD = 128  # layer_3 out: 1   -> 128 (lane-dense store; real value in col 0)


def _round_up(x, m):
    return (x + m - 1) // m * m


def critic_kernel(state_ref, action_ref, w1s_ref, w1a_ref, b1_ref,
                  w2_ref, b2_ref, w3_ref, b3_ref, out_ref):
    # ---- layer 1 (split over state/action operands: no in-kernel concat) ----
    h1 = jnp.dot(state_ref[...], w1s_ref[...], preferred_element_type=jnp.float32)
    h1 = h1 + jnp.dot(action_ref[...], w1a_ref[...],
                      preferred_element_type=jnp.float32)
    h1 = jnp.maximum(h1 + b1_ref[...], 0.0)                       # (TB, 512)

    # ---- layer 2 + ReLU (lane-aligned 512 -> 384) ----
    h2 = jnp.dot(h1, w2_ref[...], preferred_element_type=jnp.float32) + b2_ref[...]
    h2 = jnp.maximum(h2, 0.0)                                     # (TB, 384)

    # ---- layer 3: w3 zero-padded to 128 output lanes -> dense (TB,128) store.
    #      b3 read as a scalar from SMEM.  Column 0 is the real Q value.
    q = jnp.dot(h2, w3_ref[...], preferred_element_type=jnp.float32) + b3_ref[0]
    out_ref[...] = q.astype(out_ref.dtype)


def critic_forward(state, action, p, *, block_b=512):
    """Critic forward pass on TPU via Pallas.

    state : (B, state_dim)  f32
    action: (B, action_dim) f32
    p     : padded params from pad_params()
    returns (B, 1) f32
    """
    B, S = state.shape
    A = action.shape[1]

    # Batch tiling: sublane-aligned tile, batch padded up to a tile multiple.
    TB = min(block_b, _round_up(B, 8))
    Bp = _round_up(B, TB)
    if Bp != B:
        state = jnp.pad(state, ((0, Bp - B), (0, 0)))
        action = jnp.pad(action, ((0, Bp - B), (0, 0)))

    batch_map = lambda i: (i, 0)   # batch-tiled operands
    const_map = lambda i: (0, 0)   # weights/biases stay resident across steps

    out = pl.pallas_call(
        critic_kernel,
        out_shape=jax.ShapeDtypeStruct((Bp, OUT_PAD), jnp.float32),
        grid=(Bp // TB,),
        in_specs=[
            pl.BlockSpec((TB, S), batch_map),            # state tile
            pl.BlockSpec((TB, A), batch_map),            # action tile
            pl.BlockSpec((S, H1), const_map),            # w1 (state rows)
            pl.BlockSpec((A, H1), const_map),            # w1 (action rows)
            pl.BlockSpec((1, H1), const_map),            # b1
            pl.BlockSpec((H1, H2), const_map),           # w2
            pl.BlockSpec((1, H2), const_map),            # b2
            pl.BlockSpec((H2, OUT_PAD), const_map),      # w3 (padded to 128 cols)
            pl.BlockSpec((1,), lambda i: (0,),
                         memory_space=pltpu.MemorySpace.SMEM),   # b3 scalar
        ],
        out_specs=pl.BlockSpec((TB, OUT_PAD), batch_map),
        compiler_params=pltpu.CompilerParams(
            dimension_semantics=("parallel",)),
    )(state, action, p["w1s"], p["w1a"], p["b1"], p["w2"], p["b2"],
      p["w3"], p["b3"])

    return out[:B, :1]


def init_params(key, state_dim, action_dim):
    """Deterministic synthetic parameters (same shapes as the nn.Module)."""
    dims = [(state_dim + action_dim, 400), (400, 300), (300, 1)]
    keys = jax.random.split(key, 2 * len(dims))
    params = {}
    for i, (fan_in, fan_out) in enumerate(dims):
        bound = 1.0 / jnp.sqrt(jnp.float32(fan_in))
        w = jax.random.uniform(keys[2 * i], (fan_in, fan_out),
                               dtype=jnp.float32, minval=-bound, maxval=bound)
        b = jax.random.uniform(keys[2 * i + 1], (1, fan_out),
                               dtype=jnp.float32, minval=-bound, maxval=bound)
        params[f"w{i+1}"] = w
        params[f"b{i+1}"] = b
    return params


def pad_params(params, state_dim):
    """Split w1 across state/action rows and zero-pad everything lane-aligned."""
    w1, b1 = params["w1"], params["b1"]   # (S+A, 400), (1, 400)
    w2, b2 = params["w2"], params["b2"]   # (400, 300), (1, 300)
    w3, b3 = params["w3"], params["b3"]   # (300, 1),   (1, 1)

    pad_cols = lambda x, n: jnp.pad(x, ((0, 0), (0, n - x.shape[1])))
    return {
        "w1s": pad_cols(w1[:state_dim], H1),                       # (S, 512)
        "w1a": pad_cols(w1[state_dim:], H1),                       # (A, 512)
        "b1":  pad_cols(b1, H1),                                   # (1, 512)
        "w2":  jnp.pad(w2, ((0, H1 - w2.shape[0]),
                            (0, H2 - w2.shape[1]))),               # (512, 384)
        "b2":  pad_cols(b2, H2),                                   # (1, 384)
        "w3":  jnp.pad(w3, ((0, H2 - w3.shape[0]),
                            (0, OUT_PAD - w3.shape[1]))),          # (384, 128)
        "b3":  b3.reshape(1).astype(jnp.float32),                  # (1,) SMEM scalar
    }


def critic_reference(state, action, params):
    """Pure-JAX reference (unpadded params) for correctness check."""
    x = jnp.concatenate([state, action], axis=1)
    x = jnp.maximum(x @ params["w1"] + params["b1"], 0.0)
    x = jnp.maximum(x @ params["w2"] + params["b2"], 0.0)
    return x @ params["w3"] + params["b3"]


if __name__ == "__main__":
    state_dim, action_dim = 3, 1   # Pendulum-v1
    key = jax.random.PRNGKey(0)
    k_params, k_data = jax.random.split(key)

    params = init_params(k_params, state_dim, action_dim)
    padded = pad_params(params, state_dim)

    # Two small batches: one tile-exact (8) and one exercising batch padding (20).
    for batch in (8, 20):
        ks, ka = jax.random.split(jax.random.fold_in(k_data, batch))
        state = jax.random.normal(ks, (batch, state_dim), dtype=jnp.float32)
        action = jax.random.normal(ka, (batch, action_dim), dtype=jnp.float32)

        q = critic_forward(state, action, padded)
        q = jax.block_until_ready(q)
        q_ref = critic_reference(state, action, params)

        assert q.shape == (batch, 1)
        max_err = float(jnp.max(jnp.abs(q - q_ref)))
        assert jnp.allclose(q, q_ref, atol=1e-4, rtol=1e-4), \
            f"mismatch vs reference (max abs err {max_err})"

    print("KERNEL_OK")
</pallas_src>

<mosaic_0001>
module attributes {stable_mosaic.version = 11 : i64} {
  func.func @critic_kernel(%arg0: i32, %arg1: memref<8x3xf32, #tpu.memory_space<vmem>>, %arg2: memref<8x1xf32, #tpu.memory_space<vmem>>, %arg3: memref<3x512xf32, #tpu.memory_space<vmem>>, %arg4: memref<1x512xf32, #tpu.memory_space<vmem>>, %arg5: memref<1x512xf32, #tpu.memory_space<vmem>>, %arg6: memref<512x384xf32, #tpu.memory_space<vmem>>, %arg7: memref<1x384xf32, #tpu.memory_space<vmem>>, %arg8: memref<384x128xf32, #tpu.memory_space<vmem>>, %arg9: memref<1xf32, #tpu.memory_space<smem>>, %arg10: memref<8x128xf32, #tpu.memory_space<vmem>>) attributes {dimension_semantics = [#tpu.dimension_semantics<parallel>], iteration_bounds = array<i64: 1>, scalar_prefetch = 0 : i64, scratch_operands = 0 : i64, tpu.core_type = #tpu.core_type<tc>, window_params = [{transform_indices = @transform_0, window_bounds = array<i64: 8, 3>}, {transform_indices = @transform_1, window_bounds = array<i64: 8, 1>}, {pipeline_mode = #tpu.pipeline_mode<synchronous>, transform_indices = @transform_2, window_bounds = array<i64: 3, 512>}, {pipeline_mode = #tpu.pipeline_mode<synchronous>, transform_indices = @transform_3, window_bounds = array<i64: 1, 512>}, {pipeline_mode = #tpu.pipeline_mode<synchronous>, transform_indices = @transform_4, window_bounds = array<i64: 1, 512>}, {pipeline_mode = #tpu.pipeline_mode<synchronous>, transform_indices = @transform_5, window_bounds = array<i64: 512, 384>}, {pipeline_mode = #tpu.pipeline_mode<synchronous>, transform_indices = @transform_6, window_bounds = array<i64: 1, 384>}, {pipeline_mode = #tpu.pipeline_mode<synchronous>, transform_indices = @transform_7, window_bounds = array<i64: 384, 128>}, {transform_indices = @transform_8, window_bounds = array<i64: 1>}, {transform_indices = @transform_9, window_bounds = array<i64: 8, 128>}]} {
    %c0 = arith.constant 0 : index
    %c0_0 = arith.constant 0 : index
    %0 = vector.load %arg1[%c0, %c0_0] : memref<8x3xf32, #tpu.memory_space<vmem>>, vector<8x3xf32>
    %c0_1 = arith.constant 0 : index
    %c0_2 = arith.constant 0 : index
    %1 = vector.load %arg3[%c0_1, %c0_2] : memref<3x512xf32, #tpu.memory_space<vmem>>, vector<3x512xf32>
    %cst = arith.constant dense<0.000000e+00> : vector<8x512xf32>
    %2 = tpu.matmul %0, %1, %cst {dimension_numbers = #tpu.dot_dimension_numbers<[1], [0], [0], [1], [0, 0, 1, 1], [], []>} : vector<8x3xf32>, vector<3x512xf32>, vector<8x512xf32> -> vector<8x512xf32>
    %c0_3 = arith.constant 0 : index
    %c0_4 = arith.constant 0 : index
    %3 = vector.load %arg2[%c0_3, %c0_4] : memref<8x1xf32, #tpu.memory_space<vmem>>, vector<8x1xf32>
    %c0_5 = arith.constant 0 : index
    %c0_6 = arith.constant 0 : index
    %4 = vector.load %arg4[%c0_5, %c0_6] : memref<1x512xf32, #tpu.memory_space<vmem>>, vector<1x512xf32>
    %cst_7 = arith.constant dense<0.000000e+00> : vector<8x512xf32>
    %5 = tpu.matmul %3, %4, %cst_7 {dimension_numbers = #tpu.dot_dimension_numbers<[1], [0], [0], [1], [0, 0, 1, 1], [], []>} : vector<8x1xf32>, vector<1x512xf32>, vector<8x512xf32> -> vector<8x512xf32>
    %6 = arith.addf %2, %5 : vector<8x512xf32>
    %c0_8 = arith.constant 0 : index
    %c0_9 = arith.constant 0 : index
    %7 = vector.load %arg5[%c0_8, %c0_9] : memref<1x512xf32, #tpu.memory_space<vmem>>, vector<1x512xf32>
    %8 = vector.broadcast %7 : vector<1x512xf32> to vector<8x512xf32>
    %9 = arith.addf %6, %8 : vector<8x512xf32>
    %cst_10 = arith.constant 0.000000e+00 : f32
    %10 = vector.broadcast %cst_10 : f32 to vector<8x512xf32>
    %11 = arith.maximumf %9, %10 : vector<8x512xf32>
    %c0_11 = arith.constant 0 : index
    %c0_12 = arith.constant 0 : index
    %12 = vector.load %arg6[%c0_11, %c0_12] : memref<512x384xf32, #tpu.memory_space<vmem>>, vector<512x384xf32>
    %cst_13 = arith.constant dense<0.000000e+00> : vector<8x384xf32>
    %13 = tpu.matmul %11, %12, %cst_13 {dimension_numbers = #tpu.dot_dimension_numbers<[1], [0], [0], [1], [0, 0, 1, 1], [], []>} : vector<8x512xf32>, vector<512x384xf32>, vector<8x384xf32> -> vector<8x384xf32>
    %c0_14 = arith.constant 0 : index
    %c0_15 = arith.constant 0 : index
    %14 = vector.load %arg7[%c0_14, %c0_15] : memref<1x384xf32, #tpu.memory_space<vmem>>, vector<1x384xf32>
    %15 = vector.broadcast %14 : vector<1x384xf32> to vector<8x384xf32>
    %16 = arith.addf %13, %15 : vector<8x384xf32>
    %cst_16 = arith.constant 0.000000e+00 : f32
    %17 = vector.broadcast %cst_16 : f32 to vector<8x384xf32>
    %18 = arith.maximumf %16, %17 : vector<8x384xf32>
    %c0_17 = arith.constant 0 : index
    %c0_18 = arith.constant 0 : index
    %19 = vector.load %arg8[%c0_17, %c0_18] : memref<384x128xf32, #tpu.memory_space<vmem>>, vector<384x128xf32>
    %cst_19 = arith.constant dense<0.000000e+00> : vector<8x128xf32>
    %20 = tpu.matmul %18, %19, %cst_19 {dimension_numbers = #tpu.dot_dimension_numbers<[1], [0], [0], [1], [0, 0, 1, 1], [], []>} : vector<8x384xf32>, vector<384x128xf32>, vector<8x128xf32> -> vector<8x128xf32>
    %c0_20 = arith.constant 0 : index
    %21 = memref.load %arg9[%c0_20] : memref<1xf32, #tpu.memory_space<smem>>
    %22 = vector.broadcast %21 : f32 to vector<8x128xf32>
    %23 = arith.addf %20, %22 : vector<8x128xf32>
    %c0_21 = arith.constant 0 : index
    %c0_22 = arith.constant 0 : index
    %24 = vector.load %arg10[%c0_21, %c0_22] : memref<8x128xf32, #tpu.memory_space<vmem>>, vector<8x128xf32>
    tpu.vector_store %arg10[%c0_21, %c0_22], %23 {strides = array<i32>} : memref<8x128xf32, #tpu.memory_space<vmem>>, vector<8x128xf32>,
    return
  }
  func.func @transform_0(%arg0: i32) -> (i32, i32) {
    %c0_i32 = arith.constant 0 : i32
    %c0_i32_0 = arith.constant 0 : i32
    return %arg0, %c0_i32 : i32, i32
  }
  func.func @transform_1(%arg0: i32) -> (i32, i32) {
    %c0_i32 = arith.constant 0 : i32
    %c0_i32_0 = arith.constant 0 : i32
    return %arg0, %c0_i32 : i32, i32
  }
  func.func @transform_2(%arg0: i32) -> (i32, i32) {
    %c0_i32 = arith.constant 0 : i32
    %c0_i32_0 = arith.constant 0 : i32
    %c0_i32_1 = arith.constant 0 : i32
    return %c0_i32, %c0_i32_0 : i32, i32
  }
  func.func @transform_3(%arg0: i32) -> (i32, i32) {
    %c0_i32 = arith.constant 0 : i32
    %c0_i32_0 = arith.constant 0 : i32
    %c0_i32_1 = arith.constant 0 : i32
    return %c0_i32, %c0_i32_0 : i32, i32
  }
  func.func @transform_4(%arg0: i32) -> (i32, i32) {
    %c0_i32 = arith.constant 0 : i32
    %c0_i32_0 = arith.constant 0 : i32
    %c0_i32_1 = arith.constant 0 : i32
    return %c0_i32, %c0_i32_0 : i32, i32
  }
  func.func @transform_5(%arg0: i32) -> (i32, i32) {
    %c0_i32 = arith.constant 0 : i32
    %c0_i32_0 = arith.constant 0 : i32
    %c0_i32_1 = arith.constant 0 : i32
    return %c0_i32, %c0_i32_0 : i32, i32
  }
  func.func @transform_6(%arg0: i32) -> (i32, i32) {
    %c0_i32 = arith.constant 0 : i32
    %c0_i32_0 = arith.constant 0 : i32
    %c0_i32_1 = arith.constant 0 : i32
    return %c0_i32, %c0_i32_0 : i32, i32
  }
  func.func @transform_7(%arg0: i32) -> (i32, i32) {
    %c0_i32 = arith.constant 0 : i32
    %c0_i32_0 = arith.constant 0 : i32
    %c0_i32_1 = arith.constant 0 : i32
    return %c0_i32, %c0_i32_0 : i32, i32
  }
  func.func @transform_8(%arg0: i32) -> i32 {
    %c0_i32 = arith.constant 0 : i32
    %c0_i32_0 = arith.constant 0 : i32
    return %c0_i32 : i32
  }
  func.func @transform_9(%arg0: i32) -> (i32, i32) {
    %c0_i32 = arith.constant 0 : i32
    %c0_i32_0 = arith.constant 0 : i32
    return %arg0, %c0_i32 : i32, i32
  }
}

</mosaic_0001>

<bundles_post_ra>
// kernel: tpu_custom_call.1
= control target key start
LH: loop header
LB: loop body
LE: loop exit
PB: predicated region body
PF: predicated region fallthrough
CT: control target
= control target key end

     0   :  { %15 = vsyncpa [#allocation4], 0  ;;  %s1527_s0 = inlined_call_operand.vmem [shape: f32[8,3], index: 0, kind: input, shape index: {}]   ;;  %s1528_s1 = inlined_call_operand.vmem [shape: f32[8,1], index: 1, kind: input, shape index: {}]   ;;  %s1529_s2 = inlined_call_operand.vmem [shape: f32[3,512], index: 2, kind: input, shape index: {}]   ;;  %s1530_s3 = inlined_call_operand.vmem [shape: f32[1,512], index: 3, kind: input, shape index: {}]   ;;  %s1531_s4 = inlined_call_operand.vmem [shape: f32[1,512], index: 4, kind: input, shape index: {}]   ;;  %s1532_s5 = inlined_call_operand.hbm [shape: f32[512,384], index: 5, kind: input, shape index: {}]   ;;  %s1533_s6 = inlined_call_operand.vmem [shape: f32[1,384], index: 6, kind: input, shape index: {}]   ;;  %s1534_s7 = inlined_call_operand.hbm [shape: f32[384,128], index: 7, kind: input, shape index: {}]   ;;  %s1535_s8 = inlined_call_operand.<no memory space> [shape: f32[1], index: 8, kind: input, shape index: {}]   ;;  %s1536_s9 = inlined_call_operand.hbm [shape: f32[8,128], index: 9, kind: output, shape index: {}]  }
   0x1   :  { %16 = vsyncpa [#allocation7], 0 }
   0x2   :  { %17 = vsyncpa [#allocation5], 0  ;;  %s1375_s30 = smov [#allocation3]  }
   0x3   :  { %s33_s10 = sshll.u32 %s1375_s30, 4  ;;  %s34_s10 = int_to_ptr.vmem [resolvable:$true] %s33_s10 }
   0x4   :  { %s1317_s11 = scalar_lea.vmem %s34_s10, 24576  ;;  %p1322_p1 = scmp.lt.s32.totalorder %s34_s10, %s34_s10 }
   0x5   :  { %p1318_p0 = scmp.ne.s32.totalorder %s34_s10, %s1317_s11  ;;  %p1323_p2 = scmp.lt.s32.totalorder %s1317_s11, %s1317_s11 }
   0x7   :  { %p1324_p3 = por %p1323_p2, %p1322_p1 }
   0x9   :  { %p1325_p4 = pnand %p1324_p3, %p1318_p0 }
   0xb   :  { %1328 = shalt.err (!%p1325_p4)
}
   0xc   :  { %s1376_s12 = smov 384   ;;  %s1377_s13 = smov 24  }
   0xd   :  { %39 = dma.hbm_to_vmem [thread:$0]  %s1532_s5, 24576, %s34_s10, [#allocation4], %s1376_s12, %s1376_s12, %s1377_s13  }
   0xe   :  { %s1378_s16 = smov [#allocation6]  }
   0xf   :  { %s47_s17 = sshll.u32 %s1378_s16, 4  ;;  %s48_s17 = int_to_ptr.vmem [resolvable:$true] %s47_s17 }
  0x10   :  { %s1337_s18 = scalar_lea.vmem %s48_s17, 6144  ;;  %p1342_p6 = scmp.lt.s32.totalorder %s48_s17, %s48_s17 }
  0x11   :  { %p1338_p5 = scmp.ne.s32.totalorder %s48_s17, %s1337_s18  ;;  %p1343_p7 = scmp.lt.s32.totalorder %s1337_s18, %s1337_s18 }
  0x13   :  { %p1344_p8 = por %p1343_p7, %p1342_p6 }
  0x15   :  { %p1345_p9 = pnand %p1344_p8, %p1338_p5 }
  0x17   :  { %1348 = shalt.err (!%p1345_p9)
}
  0x18   :  { %s1379_s19 = smov 128   ;;  %s1380_s20 = smov 8  }
  0x19   :  { %53 = dma.hbm_to_vmem [thread:$0]  %s1534_s7, 6144, %s48_s17, [#allocation7], %s1379_s19, %s1379_s19, %s1380_s20  }
  0x1a   :  { %1369 = dma.done.wait [#allocation4], 24576  }
  0x1b   :  { %1370 = vsyncadd [#allocation4], 4294942720 }
  0x1c   :  { %1371 = dma.done.wait [#allocation7], 6144  }
  0x1d   :  { %1372 = vsyncadd [#allocation7], 4294961152  ;;  %v68_v0 = vlaneseq  ;;  %v1381_v1 = vmov 0.0   ;;  %v66_v7 = vld [vmem:[%s1530_s3] sm:$0xf]  ;;  %vm88_vm0 = vcmask 1040384  }
  0x1e   :  { %161 = vmatprep.mubr.f32.mxu0 %v1381_v1  ;;  %232 = vmatprep.mubr.f32.mxu1 %v1381_v1  ;;  %v63_v8 = vld [vmem:[%s1529_s2] sm:$0x77]  ;;  %v64_v13 = vld [vmem:[%s1529_s2 + $0x8] sm:$0x77]  ;;  %vm84_vm1 = vcmask 7168   ;;  %vm247_vm2 = vcmask 1042432  }
  0x1f   :  { %v1442_v2 = vshrl.u32 %v68_v0, 7  ;;  %v65_v14 = vld [vmem:[%s1528_s1] sm:$0xff]  ;;  %v241_v15 = vcombine.high %v63_v8, %v63_v8  ;;  %v242_v16 = vcombine.high %v64_v13, %v64_v13  ;;  %vm243_vm3 = vcmask 23552   ;;  %v474_v18 = vld [vmem:[#allocation3 + $0x170] sm:$0xff]  ;;  %v473_v20 = vld [vmem:[#allocation3 + $0x168] sm:$0xff]  ;;  %s1383_s10 = smov [#allocation8]  }
  0x20   :  { %v62_v17 = vld [vmem:[%s1527_s0] sm:$0xff]  ;;  %v570_v19 = vld [vmem:[#allocation3 + $0x470] sm:$0xff]  ;;  %v569_v21 = vld [vmem:[#allocation3 + $0x468] sm:$0xff]  ;;  %vm1382_vm4 = vmmov 0   ;;  %s1119_s11 = sshll.u32 %s1383_s10, 4  ;;  %s1120_s11 = int_to_ptr.vmem [resolvable:$true] %s1119_s11 }
  0x21   :  { %v1445_v3 = vsub.s32 1, %v1442_v2  ;;  %v82_v4 = vsub.s32 3, %v1442_v2  ;;  %v1449_v5 = vsub.s32 0, %v1442_v2  ;;  %v1452_v6 = vsub.s32 2, %v1442_v2  ;;  %v471_v22 = vld [vmem:[#allocation3 + $0x158] sm:$0xff]  ;;  %v470_v24 = vld [vmem:[#allocation3 + $0x150] sm:$0xff]  ;;  %p1354_p11 = scmp.lt.s32.totalorder %s1120_s11, %s1120_s11 }
  0x22   :  { %v567_v23 = vld [vmem:[#allocation3 + $0x458] sm:$0xff]  ;;  %v566_v25 = vld [vmem:[#allocation3 + $0x450] sm:$0xff]  ;;  %v468_v26 = vld [vmem:[#allocation3 + $0x140] sm:$0xff]  ;;  %s1349_s12 = scalar_lea.vmem %s1120_s11, 128 }
  0x23   :  { %v75_v9 = vrot.slane %v66_v7, %v1445_v3  ;;  %v83_v10 = vrot.slane %v66_v7, %v82_v4  ;;  %v71_v11 = vrot.slane %v66_v7, %v1449_v5  ;;  %v79_v12 = vrot.slane %v66_v7, %v1452_v6  ;;  %v564_v27 = vld [vmem:[#allocation3 + $0x440] sm:$0xff]  ;;  %v467_v28 = vld [vmem:[#allocation3 + $0x138] sm:$0xff]  ;;  %v465_v30 = vld [vmem:[#allocation3 + $0x128] sm:$0xff]  ;;  %p1350_p10 = scmp.ne.s32.totalorder %s1120_s11, %s1349_s12  ;;  %p1355_p12 = scmp.lt.s32.totalorder %s1349_s12, %s1349_s12 }
  0x24   :  { %v563_v29 = vld [vmem:[#allocation3 + $0x438] sm:$0xff]  ;;  %v561_v31 = vld [vmem:[#allocation3 + $0x428] sm:$0xff]  ;;  %v464_v32 = vld [vmem:[#allocation3 + $0x120] sm:$0xff] }
  0x25   :  { %1129 = vmatprep.subr.msk.mxu0 %vm88_vm0, %v75_v9  ;;  %1132 = vmatprep.subr.msk.mxu1 %vm88_vm0, %v83_v10  ;;  %v560_v33 = vld [vmem:[#allocation3 + $0x420] sm:$0xff]  ;;  %v462_v34 = vld [vmem:[#allocation3 + $0x110] sm:$0xff]  ;;  %v461_v36 = vld [vmem:[#allocation3 + $0x108] sm:$0xff]  ;;  %p1356_p13 = por %p1355_p12, %p1354_p11 }
  0x26   :  { %1130 = vmatpush1.msk.msra.mxu0 %vm88_vm0, %v71_v11  ;;  %1133 = vmatpush1.msk.msra.mxu1 %vm88_vm0, %v79_v12  ;;  %v558_v35 = vld [vmem:[#allocation3 + $0x410] sm:$0xff]  ;;  %v557_v37 = vld [vmem:[#allocation3 + $0x408] sm:$0xff]  ;;  %v459_v38 = vld [vmem:[#allocation3 + $0xf8] sm:$0xff] }
  0x27   :  { %1131 = vmatmul.mubr.msk.f32.vlgmr.msra.gmra.mxu0 %vm84_vm1, %v65_v14  ;;  %1134 = vmatmul.mubr.msk.f32.vlgmr.msra.gmra.mxu1 %vm84_vm1, %v65_v14  ;;  %v555_v39 = vld [vmem:[#allocation3 + $0x3f8] sm:$0xff]  ;;  %v458_v40 = vld [vmem:[#allocation3 + $0xf0] sm:$0xff]  ;;  %v456_v42 = vld [vmem:[#allocation3 + $0xe0] sm:$0xff]  ;;  %p1357_p0 = pnand %p1356_p13, %p1350_p10 }
  0x28   :  { %1135 = vmatprep.subr.msk.mxu0 %vm247_vm2, %v241_v15  ;;  %1138 = vmatprep.subr.msk.mxu1 %vm247_vm2, %v242_v16  ;;  %v554_v41 = vld [vmem:[#allocation3 + $0x3f0] sm:$0xff]  ;;  %v552_v43 = vld [vmem:[#allocation3 + $0x3e0] sm:$0xff]  ;;  %v455_v44 = vld [vmem:[#allocation3 + $0xd8] sm:$0xff] }
  0x29   :  { %1136 = vmatpush1.msk.msra.mxu0 %vm247_vm2, %v63_v8  ;;  %320 = vmatprep.mubr.f32.mxu0 %v1381_v1  ;;  %v551_v45 = vld [vmem:[#allocation3 + $0x3d8] sm:$0xff]  ;;  %v453_v46 = vld [vmem:[#allocation3 + $0xc8] sm:$0xff]  ;;  %v452_v48 = vld [vmem:[#allocation3 + $0xc0] sm:$0xff] }
  0x2a   :  { %1139 = vmatpush1.msk.msra.mxu1 %vm247_vm2, %v64_v13  ;;  %391 = vmatprep.mubr.f32.mxu1 %v1381_v1  ;;  %v549_v47 = vld [vmem:[#allocation3 + $0x3c8] sm:$0xff]  ;;  %v548_v49 = vld [vmem:[#allocation3 + $0x3c0] sm:$0xff]  ;;  %v450_v50 = vld [vmem:[#allocation3 + $0xb0] sm:$0xff] }
  0x2b   :  { %1137 = vmatmul.mubr.msk.f32.vlgmr.msra.gmra.mxu0 %vm243_vm3, %v62_v17  ;;  %1140 = vmatmul.mubr.msk.f32.vlgmr.msra.gmra.mxu1 %vm243_vm3, %v62_v17  ;;  %v546_v51 = vld [vmem:[#allocation3 + $0x3b0] sm:$0xff]  ;;  %v449_v52 = vld [vmem:[#allocation3 + $0xa8] sm:$0xff]  ;;  %v447_v54 = vld [vmem:[#allocation3 + $0x98] sm:$0xff] }
  0x2c   :  { %637 = vmatprep.subr.mxu0 %v474_v18  ;;  %708 = vmatprep.subr.mxu1 %v570_v19  ;;  %v545_v53 = vld [vmem:[#allocation3 + $0x3a8] sm:$0xff]  ;;  %v543_v55 = vld [vmem:[#allocation3 + $0x398] sm:$0xff]  ;;  %v446_v56 = vld [vmem:[#allocation3 + $0x90] sm:$0xff] }
  0x2d   :  { %638 = vmatpush1.msra.mxu0 %v473_v20  ;;  %709 = vmatpush1.msra.mxu1 %v569_v21  ;;  %v542_v57 = vld [vmem:[#allocation3 + $0x390] sm:$0xff]  ;;  %v444_v58 = vld [vmem:[#allocation3 + $0x80] sm:$0xff]  ;;  %v443_v60 = vld [vmem:[#allocation3 + $0x78] sm:$0xff] }
  0x2e   :  { %639 = vmatprep.subr.mxu0 %v471_v22  ;;  %710 = vmatprep.subr.mxu1 %v567_v23  ;;  %v540_v59 = vld [vmem:[#allocation3 + $0x380] sm:$0xff]  ;;  %v539_v61 = vld [vmem:[#allocation3 + $0x378] sm:$0xff]  ;;  %v441_v62 = vld [vmem:[#allocation3 + $0x68] sm:$0xff] }
  0x2f   :  { %640 = vmatpush1.msra.mxu0 %v470_v24  ;;  %711 = vmatpush1.msra.mxu1 %v566_v25  ;;  %v537_v63 = vld [vmem:[#allocation3 + $0x368] sm:$0xff]  ;;  %v440_v0 = vld [vmem:[#allocation3 + $0x60] sm:$0xff]  ;;  %v438_v8 = vld [vmem:[#allocation3 + $0x50] sm:$0xff] }
  0x30   :  { %641 = vmatprep.subr.mxu0 %v468_v26  ;;  %712 = vmatprep.subr.mxu1 %v564_v27  ;;  %v536_v7 = vld [vmem:[#allocation3 + $0x360] sm:$0xff]  ;;  %v534_v9 = vld [vmem:[#allocation3 + $0x350] sm:$0xff]  ;;  %v437_v10 = vld [vmem:[#allocation3 + $0x48] sm:$0xff] }
  0x31   :  { %642 = vmatpush1.msra.mxu0 %v467_v28  ;;  %713 = vmatpush1.msra.mxu1 %v563_v29  ;;  %v533_v11 = vld [vmem:[#allocation3 + $0x348] sm:$0xff]  ;;  %v435_v12 = vld [vmem:[#allocation3 + $0x38] sm:$0xff]  ;;  %v434_v14 = vld [vmem:[#allocation3 + $0x30] sm:$0xff] }
  0x32   :  { %643 = vmatprep.subr.mxu0 %v465_v30  ;;  %714 = vmatprep.subr.mxu1 %v561_v31  ;;  %v531_v13 = vld [vmem:[#allocation3 + $0x338] sm:$0xff]  ;;  %v530_v15 = vld [vmem:[#allocation3 + $0x330] sm:$0xff]  ;;  %v432_v16 = vld [vmem:[#allocation3 + $0x20] sm:$0xff] }
  0x33   :  { %644 = vmatpush1.msra.mxu0 %v464_v32  ;;  %715 = vmatpush1.msra.mxu1 %v560_v33  ;;  %v528_v17 = vld [vmem:[#allocation3 + $0x320] sm:$0xff]  ;;  %v431_v18 = vld [vmem:[#allocation3 + $0x18] sm:$0xff]  ;;  %v429_v20 = vld [vmem:[#allocation3 + $0x8] sm:$0xff] }
  0x34   :  { %645 = vmatprep.subr.mxu0 %v462_v34  ;;  %716 = vmatprep.subr.mxu1 %v558_v35  ;;  %v527_v19 = vld [vmem:[#allocation3 + $0x318] sm:$0xff]  ;;  %v525_v21 = vld [vmem:[#allocation3 + $0x308] sm:$0xff]  ;;  %v428_v22 = vld [vmem:[#allocation3] sm:$0xff] }
  0x35   :  { %646 = vmatpush1.msra.mxu0 %v461_v36  ;;  %717 = vmatpush1.msra.mxu1 %v557_v37  ;;  %v524_v23 = vld [vmem:[#allocation3 + $0x300] sm:$0xff]  ;;  %v522_v24 = vld [vmem:[#allocation3 + $0x2f0] sm:$0xff]  ;;  %v521_v26 = vld [vmem:[#allocation3 + $0x2e8] sm:$0xff] }
  0x36   :  { %647 = vmatprep.subr.mxu0 %v459_v38  ;;  %718 = vmatprep.subr.mxu1 %v555_v39  ;;  %v618_v25 = vld [vmem:[#allocation3 + $0x5f0] sm:$0xff]  ;;  %v617_v27 = vld [vmem:[#allocation3 + $0x5e8] sm:$0xff]  ;;  %v519_v28 = vld [vmem:[#allocation3 + $0x2d8] sm:$0xff] }
  0x37   :  { %648 = vmatpush1.msra.mxu0 %v458_v40  ;;  %719 = vmatpush1.msra.mxu1 %v554_v41  ;;  %v615_v29 = vld [vmem:[#allocation3 + $0x5d8] sm:$0xff]  ;;  %v518_v30 = vld [vmem:[#allocation3 + $0x2d0] sm:$0xff]  ;;  %v516_v32 = vld [vmem:[#allocation3 + $0x2c0] sm:$0xff] }
  0x38   :  { %649 = vmatprep.subr.mxu0 %v456_v42  ;;  %720 = vmatprep.subr.mxu1 %v552_v43  ;;  %v614_v31 = vld [vmem:[#allocation3 + $0x5d0] sm:$0xff]  ;;  %v612_v33 = vld [vmem:[#allocation3 + $0x5c0] sm:$0xff]  ;;  %v515_v34 = vld [vmem:[#allocation3 + $0x2b8] sm:$0xff] }
  0x39   :  { %650 = vmatpush1.msra.mxu0 %v455_v44  ;;  %721 = vmatpush1.msra.mxu1 %v551_v45  ;;  %v611_v35 = vld [vmem:[#allocation3 + $0x5b8] sm:$0xff]  ;;  %v513_v36 = vld [vmem:[#allocation3 + $0x2a8] sm:$0xff]  ;;  %v512_v38 = vld [vmem:[#allocation3 + $0x2a0] sm:$0xff] }
  0x3a   :  { %651 = vmatprep.subr.mxu0 %v453_v46  ;;  %722 = vmatprep.subr.mxu1 %v549_v47  ;;  %v609_v37 = vld [vmem:[#allocation3 + $0x5a8] sm:$0xff]  ;;  %v608_v39 = vld [vmem:[#allocation3 + $0x5a0] sm:$0xff]  ;;  %v510_v40 = vld [vmem:[#allocation3 + $0x290] sm:$0xff] }
  0x3b   :  { %652 = vmatpush1.msra.mxu0 %v452_v48  ;;  %723 = vmatpush1.msra.mxu1 %v548_v49  ;;  %v606_v41 = vld [vmem:[#allocation3 + $0x590] sm:$0xff]  ;;  %v509_v42 = vld [vmem:[#allocation3 + $0x288] sm:$0xff]  ;;  %v507_v44 = vld [vmem:[#allocation3 + $0x278] sm:$0xff] }
  0x3c   :  { %653 = vmatprep.subr.mxu0 %v450_v50  ;;  %724 = vmatprep.subr.mxu1 %v546_v51  ;;  %v605_v43 = vld [vmem:[#allocation3 + $0x588] sm:$0xff]  ;;  %v603_v45 = vld [vmem:[#allocation3 + $0x578] sm:$0xff]  ;;  %v506_v46 = vld [vmem:[#allocation3 + $0x270] sm:$0xff] }
  0x3d   :  { %654 = vmatpush1.msra.mxu0 %v449_v52  ;;  %725 = vmatpush1.msra.mxu1 %v545_v53  ;;  %v602_v47 = vld [vmem:[#allocation3 + $0x570] sm:$0xff]  ;;  %v504_v48 = vld [vmem:[#allocation3 + $0x260] sm:$0xff]  ;;  %v503_v50 = vld [vmem:[#allocation3 + $0x258] sm:$0xff] }
  0x3e   :  { %655 = vmatprep.subr.mxu0 %v447_v54  ;;  %726 = vmatprep.subr.mxu1 %v543_v55  ;;  %v600_v49 = vld [vmem:[#allocation3 + $0x560] sm:$0xff]  ;;  %v599_v51 = vld [vmem:[#allocation3 + $0x558] sm:$0xff]  ;;  %v501_v52 = vld [vmem:[#allocation3 + $0x248] sm:$0xff] }
  0x3f   :  { %656 = vmatpush1.msra.mxu0 %v446_v56  ;;  %727 = vmatpush1.msra.mxu1 %v542_v57  ;;  %v597_v53 = vld [vmem:[#allocation3 + $0x548] sm:$0xff]  ;;  %v500_v54 = vld [vmem:[#allocation3 + $0x240] sm:$0xff]  ;;  %v498_v56 = vld [vmem:[#allocation3 + $0x230] sm:$0xff] }
  0x40   :  { %657 = vmatprep.subr.mxu0 %v444_v58  ;;  %728 = vmatprep.subr.mxu1 %v540_v59  ;;  %v596_v55 = vld [vmem:[#allocation3 + $0x540] sm:$0xff]  ;;  %v594_v57 = vld [vmem:[#allocation3 + $0x530] sm:$0xff]  ;;  %v497_v58 = vld [vmem:[#allocation3 + $0x228] sm:$0xff] }
  0x41   :  { %658 = vmatpush1.msra.mxu0 %v443_v60  ;;  %729 = vmatpush1.msra.mxu1 %v539_v61  ;;  %v593_v59 = vld [vmem:[#allocation3 + $0x528] sm:$0xff]  ;;  %v495_v60 = vld [vmem:[#allocation3 + $0x218] sm:$0xff]  ;;  %v520_v2 = vld [vmem:[#allocation3 + $0x2e0] sm:$0xff] }
  0x42   :  { %659 = vmatprep.subr.mxu0 %v441_v62  ;;  %730 = vmatprep.subr.mxu1 %v537_v63  ;;  %v591_v61 = vld [vmem:[#allocation3 + $0x518] sm:$0xff]  ;;  %v494_v62 = vld [vmem:[#allocation3 + $0x210] sm:$0xff] }
  0x43   :  { %660 = vmatpush1.msra.mxu0 %v440_v0  ;;  %731 = vmatpush1.msra.mxu1 %v536_v7  ;;  %v590_v63 = vld [vmem:[#allocation3 + $0x510] sm:$0xff]  ;;  %v492_v0 = vld [vmem:[#allocation3 + $0x200] sm:$0xff] }
  0x44   :  { %661 = vmatprep.subr.mxu0 %v438_v8  ;;  %732 = vmatprep.subr.mxu1 %v534_v9  ;;  %v588_v7 = vld [vmem:[#allocation3 + $0x500] sm:$0xff]  ;;  %v491_v8 = vld [vmem:[#allocation3 + $0x1f8] sm:$0xff] }
  0x45   :  { %662 = vmatpush1.msra.mxu0 %v437_v10  ;;  %733 = vmatpush1.msra.mxu1 %v533_v11  ;;  %v587_v9 = vld [vmem:[#allocation3 + $0x4f8] sm:$0xff]  ;;  %v489_v10 = vld [vmem:[#allocation3 + $0x1e8] sm:$0xff] }
  0x46   :  { %663 = vmatprep.subr.mxu0 %v435_v12  ;;  %734 = vmatprep.subr.mxu1 %v531_v13  ;;  %v585_v11 = vld [vmem:[#allocation3 + $0x4e8] sm:$0xff]  ;;  %v488_v12 = vld [vmem:[#allocation3 + $0x1e0] sm:$0xff] }
  0x47   :  { %664 = vmatpush1.msra.mxu0 %v434_v14  ;;  %735 = vmatpush1.msra.mxu1 %v530_v15  ;;  %v584_v13 = vld [vmem:[#allocation3 + $0x4e0] sm:$0xff]  ;;  %v486_v14 = vld [vmem:[#allocation3 + $0x1d0] sm:$0xff] }
  0x48   :  { %665 = vmatprep.subr.mxu0 %v432_v16  ;;  %736 = vmatprep.subr.mxu1 %v528_v17  ;;  %v582_v15 = vld [vmem:[#allocation3 + $0x4d0] sm:$0xff]  ;;  %v485_v16 = vld [vmem:[#allocation3 + $0x1c8] sm:$0xff] }
  0x49   :  { %666 = vmatpush1.msra.mxu0 %v431_v18  ;;  %737 = vmatpush1.msra.mxu1 %v527_v19  ;;  %v581_v17 = vld [vmem:[#allocation3 + $0x4c8] sm:$0xff]  ;;  %v483_v18 = vld [vmem:[#allocation3 + $0x1b8] sm:$0xff] }
  0x4a   :  { %667 = vmatprep.subr.mxu0 %v429_v20  ;;  %738 = vmatprep.subr.mxu1 %v525_v21  ;;  %v579_v19 = vld [vmem:[#allocation3 + $0x4b8] sm:$0xff]  ;;  %v482_v20 = vld [vmem:[#allocation3 + $0x1b0] sm:$0xff] }
  0x4b   :  { %668 = vmatpush1.msra.mxu0 %v428_v22  ;;  %739 = vmatpush1.msra.mxu1 %v524_v23  ;;  %v578_v21 = vld [vmem:[#allocation3 + $0x4b0] sm:$0xff]  ;;  %v480_v22 = vld [vmem:[#allocation3 + $0x1a0] sm:$0xff] }
  0x4c   :  { %669 = vmatprep.subr.mxu0 %v522_v24  ;;  %740 = vmatprep.subr.mxu1 %v618_v25  ;;  %v576_v23 = vld [vmem:[#allocation3 + $0x4a0] sm:$0xff]  ;;  %v479_v24 = vld [vmem:[#allocation3 + $0x198] sm:$0xff] }
  0x4d   :  { %670 = vmatpush2.msra.mxu0 %v521_v26  ;;  %741 = vmatpush2.msra.mxu1 %v617_v27  ;;  %v575_v25 = vld [vmem:[#allocation3 + $0x498] sm:$0xff]  ;;  %v477_v26 = vld [vmem:[#allocation3 + $0x188] sm:$0xff] }
  0x4e   :  { %671 = vmatprep.subr.mxu0 %v519_v28  ;;  %742 = vmatprep.subr.mxu1 %v615_v29  ;;  %v573_v27 = vld [vmem:[#allocation3 + $0x488] sm:$0xff]  ;;  %v476_v28 = vld [vmem:[#allocation3 + $0x180] sm:$0xff] }
  0x4f   :  { %672 = vmatpush2.msra.mxu0 %v518_v30  ;;  %743 = vmatpush2.msra.mxu1 %v614_v31  ;;  %v572_v29 = vld [vmem:[#allocation3 + $0x480] sm:$0xff]  ;;  %v523_v30 = vld [vmem:[#allocation3 + $0x2f8] sm:$0xff] }
  0x50   :  { %673 = vmatprep.subr.mxu0 %v516_v32  ;;  %744 = vmatprep.subr.mxu1 %v612_v33  ;;  %v619_v31 = vld [vmem:[#allocation3 + $0x5f8] sm:$0xff] }
  0x51   :  { %674 = vmatpush2.msra.mxu0 %v515_v34  ;;  %745 = vmatpush2.msra.mxu1 %v611_v35  ;;  %v398_v34 = vld [vmem:[%s1531_s4] sm:$0xf] }
  0x52   :  { %675 = vmatprep.subr.mxu0 %v513_v36  ;;  %746 = vmatprep.subr.mxu1 %v609_v37 }
  0x53   :  { %676 = vmatpush2.msra.mxu0 %v512_v38  ;;  %747 = vmatpush2.msra.mxu1 %v608_v39  ;;  %v403_v38 = vrot.slane %v398_v34, %v1449_v5 }
  0x54   :  { %677 = vmatprep.subr.mxu0 %v510_v40  ;;  %748 = vmatprep.subr.mxu1 %v606_v41  ;;  %v411_v40 = vrot.slane %v398_v34, %v1452_v6 }
  0x55   :  { %678 = vmatpush2.msra.mxu0 %v509_v42  ;;  %749 = vmatpush2.msra.mxu1 %v605_v43  ;;  %v407_v43 = vrot.slane %v398_v34, %v1445_v3 }
  0x56   :  { %679 = vmatprep.subr.mxu0 %v507_v44  ;;  %750 = vmatprep.subr.mxu1 %v603_v45  ;;  %v415_v44 = vrot.slane %v398_v34, %v82_v4  ;;  %v616_v4 = vld [vmem:[#allocation3 + $0x5e0] sm:$0xff] }
  0x57   :  { %680 = vmatpush2.msra.mxu0 %v506_v46  ;;  %751 = vmatpush2.msra.mxu1 %v602_v47  ;;  %v544_v34 = vld [vmem:[#allocation3 + $0x3a0] sm:$0xff] }
  0x58   :  { %681 = vmatprep.subr.mxu0 %v504_v48  ;;  %752 = vmatprep.subr.mxu1 %v600_v49 }
  0x59   :  { %682 = vmatpush2.msra.mxu0 %v503_v50  ;;  %753 = vmatpush2.msra.mxu1 %v599_v51 }
  0x5a   :  { %683 = vmatprep.subr.mxu0 %v501_v52  ;;  %754 = vmatprep.subr.mxu1 %v597_v53 }
  0x5b   :  { %684 = vmatpush2.msra.mxu0 %v500_v54  ;;  %755 = vmatpush2.msra.mxu1 %v596_v55 }
  0x5c   :  { %685 = vmatprep.subr.mxu0 %v498_v56  ;;  %756 = vmatprep.subr.mxu1 %v594_v57  ;;  %v475_v57 = vld [vmem:[#allocation3 + $0x178] sm:$0xff] }
  0x5d   :  { %686 = vmatpush2.msra.mxu0 %v497_v58  ;;  %757 = vmatpush2.msra.mxu1 %v593_v59  ;;  %v571_v58 = vld [vmem:[#allocation3 + $0x478] sm:$0xff]  ;;  %v472_v59 = vld [vmem:[#allocation3 + $0x160] sm:$0xff] }
  0x5e   :  { %687 = vmatprep.subr.mxu0 %v495_v60  ;;  %758 = vmatprep.subr.mxu1 %v591_v61  ;;  %v568_v60 = vld [vmem:[#allocation3 + $0x460] sm:$0xff]  ;;  %v517_v61 = vld [vmem:[#allocation3 + $0x2c8] sm:$0xff] }
  0x5f   :  { %688 = vmatpush2.msra.mxu0 %v494_v62  ;;  %759 = vmatpush2.msra.mxu1 %v590_v63  ;;  %v613_v62 = vld [vmem:[#allocation3 + $0x5c8] sm:$0xff] }
  0x60   :  { %689 = vmatprep.subr.mxu0 %v492_v0  ;;  %760 = vmatprep.subr.mxu1 %v588_v7  ;;  %v469_v63 = vld [vmem:[#allocation3 + $0x148] sm:$0xff]  ;;  %v514_v7 = vld [vmem:[#allocation3 + $0x2b0] sm:$0xff] }
  0x61   :  { %690 = vmatpush2.msra.mxu0 %v491_v8  ;;  %761 = vmatpush2.msra.mxu1 %v587_v9  ;;  %v565_v0 = vld [vmem:[#allocation3 + $0x448] sm:$0xff]  ;;  %v610_v8 = vld [vmem:[#allocation3 + $0x5b0] sm:$0xff] }
  0x62   :  { %691 = vmatprep.subr.mxu0 %v489_v10  ;;  %762 = vmatprep.subr.mxu1 %v585_v11  ;;  %v466_v9 = vld [vmem:[#allocation3 + $0x130] sm:$0xff]  ;;  %v511_v11 = vld [vmem:[#allocation3 + $0x298] sm:$0xff] }
  0x63   :  { %692 = vmatpush2.msra.mxu0 %v488_v12  ;;  %763 = vmatpush2.msra.mxu1 %v584_v13  ;;  %v562_v10 = vld [vmem:[#allocation3 + $0x430] sm:$0xff]  ;;  %v607_v12 = vld [vmem:[#allocation3 + $0x598] sm:$0xff] }
  0x64   :  { %693 = vmatprep.subr.mxu0 %v486_v14  ;;  %764 = vmatprep.subr.mxu1 %v582_v15  ;;  %v463_v13 = vld [vmem:[#allocation3 + $0x118] sm:$0xff]  ;;  %v508_v15 = vld [vmem:[#allocation3 + $0x280] sm:$0xff] }
  0x65   :  { %694 = vmatpush2.msra.mxu0 %v485_v16  ;;  %765 = vmatpush2.msra.mxu1 %v581_v17  ;;  %v559_v14 = vld [vmem:[#allocation3 + $0x418] sm:$0xff]  ;;  %v604_v16 = vld [vmem:[#allocation3 + $0x580] sm:$0xff] }
  0x66   :  { %695 = vmatprep.subr.mxu0 %v483_v18  ;;  %766 = vmatprep.subr.mxu1 %v579_v19  ;;  %v460_v17 = vld [vmem:[#allocation3 + $0x100] sm:$0xff]  ;;  %v505_v19 = vld [vmem:[#allocation3 + $0x268] sm:$0xff] }
  0x67   :  { %696 = vmatpush2.msra.mxu0 %v482_v20  ;;  %767 = vmatpush2.msra.mxu1 %v578_v21  ;;  %v556_v18 = vld [vmem:[#allocation3 + $0x400] sm:$0xff]  ;;  %v601_v20 = vld [vmem:[#allocation3 + $0x568] sm:$0xff] }
  0x68   :  { %697 = vmatprep.subr.mxu0 %v480_v22  ;;  %768 = vmatprep.subr.mxu1 %v576_v23  ;;  %v457_v21 = vld [vmem:[#allocation3 + $0xe8] sm:$0xff]  ;;  %v502_v23 = vld [vmem:[#allocation3 + $0x250] sm:$0xff] }
  0x69   :  { %698 = vmatpush2.msra.mxu0 %v479_v24  ;;  %769 = vmatpush2.msra.mxu1 %v575_v25  ;;  %v553_v22 = vld [vmem:[#allocation3 + $0x3e8] sm:$0xff]  ;;  %v598_v24 = vld [vmem:[#allocation3 + $0x550] sm:$0xff] }
  0x6a   :  { %699 = vmatprep.subr.mxu0 %v477_v26  ;;  %770 = vmatprep.subr.mxu1 %v573_v27  ;;  %v454_v25 = vld [vmem:[#allocation3 + $0xd0] sm:$0xff]  ;;  %v499_v27 = vld [vmem:[#allocation3 + $0x238] sm:$0xff] }
  0x6b   :  { %700 = vmatpush2.msra.mxu0 %v476_v28  ;;  %771 = vmatpush2.msra.mxu1 %v572_v29  ;;  %v550_v26 = vld [vmem:[#allocation3 + $0x3d0] sm:$0xff]  ;;  %v595_v28 = vld [vmem:[#allocation3 + $0x538] sm:$0xff] }
  0x6c   :  { %1141 = vmatprep.subr.mxu0 %v523_v30  ;;  %1176 = vmatprep.subr.mxu1 %v619_v31  ;;  %v451_v29 = vld [vmem:[#allocation3 + $0xb8] sm:$0xff]  ;;  %v496_v31 = vld [vmem:[#allocation3 + $0x220] sm:$0xff] }
  0x6d   :  { %v547_v30 = vld [vmem:[#allocation3 + $0x3b8] sm:$0xff] }
  0xe7   :  { %v163_v32 = vpop.f32.mrf.mxu0  ;;  %v234_v33 = vpop.f32.mrf.mxu1 }
  0xe9   :  { %v165_v35 = vpop.f32.mrf.mxu0  ;;  %v236_v36 = vpop.f32.mrf.mxu1 }
  0xeb   :  { %v322_v37 = vpop.f32.mrf.mxu0  ;;  %v393_v39 = vpop.f32.mrf.mxu1 }
  0xec   :  { %v323_v41 = vadd.f32 %v322_v37, %v163_v32  ;;  %v394_v42 = vadd.f32 %v393_v39, %v234_v33  ;;  %v592_v32 = vld [vmem:[#allocation3 + $0x520] sm:$0xff]  ;;  %v445_v37 = vld [vmem:[#allocation3 + $0x88] sm:$0xff]  ;;  %v490_v39 = vld [vmem:[#allocation3 + $0x1f0] sm:$0xff] }
  0xed   :  { %v324_v45 = vpop.f32.mrf.mxu0  ;;  %v395_v46 = vpop.f32.mrf.mxu1  ;;  %v448_v33 = vld [vmem:[#allocation3 + $0xa0] sm:$0xff] }
  0xee   :  { %v325_v47 = vadd.f32 %v324_v45, %v165_v35  ;;  %v396_v48 = vadd.f32 %v395_v46, %v236_v36  ;;  %v1484_v49 = vadd.f32 %v403_v38, %v323_v41  ;;  %v1486_v50 = vadd.f32 %v411_v40, %v394_v42  ;;  %v493_v35 = vld [vmem:[#allocation3 + $0x208] sm:$0xff]  ;;  %v586_v40 = vld [vmem:[#allocation3 + $0x4f0] sm:$0xff]  ;;  %v439_v45 = vld [vmem:[#allocation3 + $0x58] sm:$0xff] }
  0xef   :  { %v589_v36 = vld [vmem:[#allocation3 + $0x508] sm:$0xff]  ;;  %v442_v41 = vld [vmem:[#allocation3 + $0x70] sm:$0xff]  ;;  %v535_v46 = vld [vmem:[#allocation3 + $0x358] sm:$0xff] }
  0xf0   :  { %v421_v51 = vadd.f32 %v407_v43, %v325_v47  ;;  %v423_v52 = vadd.f32 %v415_v44, %v396_v48  ;;  %v424_v55 = vmax.f32 %v1484_v49, 0.0  ;;  %v426_v56 = vmax.f32 %v1486_v50, 0.0  ;;  %v541_v38 = vld [vmem:[#allocation3 + $0x388] sm:$0xff]  ;;  %v538_v42 = vld [vmem:[#allocation3 + $0x370] sm:$0xff]  ;;  %v487_v43 = vld [vmem:[#allocation3 + $0x1d8] sm:$0xff] }
  0xf1   :  { %v583_v44 = vld [vmem:[#allocation3 + $0x4d8] sm:$0xff]  ;;  %v484_v47 = vld [vmem:[#allocation3 + $0x1c0] sm:$0xff]  ;;  %v948_v50 = vld [vmem:[#allocation6 + $0xd0] sm:$0xff] }
  0xf2   :  { %v425_v53 = vmax.f32 %v421_v51, 0.0  ;;  %v427_v54 = vmax.f32 %v423_v52, 0.0  ;;  %v580_v48 = vld [vmem:[#allocation3 + $0x4c0] sm:$0xff]  ;;  %v933_v49 = vld [vmem:[#allocation6 + $0x58] sm:$0xff] }
  0xf3   :  { %v436_v51 = vld [vmem:[#allocation3 + $0x40] sm:$0xff] }
  0xf4   :  { %701 = vmatprep.mubr.f32.mxu0 %v425_v53  ;;  %772 = vmatprep.mubr.f32.mxu1 %v427_v54  ;;  %v532_v52 = vld [vmem:[#allocation3 + $0x340] sm:$0xff] }
  0xf5   :  { %702 = vmatmul.mubr.f32.vlgmr.msra.gmra.mxu0 %v424_v55  ;;  %773 = vmatmul.mubr.f32.vlgmr.msra.gmra.mxu1 %v426_v56 }
  0xf6   :  { %1142 = vmatpush3.msra.mxu0 %v475_v57  ;;  %1177 = vmatpush3.msra.mxu1 %v571_v58  ;;  %v433_v57 = vld [vmem:[#allocation3 + $0x28] sm:$0xff] }
  0xf7   :  { %1143 = vmatprep.subr.mxu0 %v520_v2  ;;  %843 = vmatprep.mubr.f32.mxu0 %v425_v53  ;;  %v481_v53 = vld [vmem:[#allocation3 + $0x1a8] sm:$0xff]  ;;  %v478_v2 = vld [vmem:[#allocation3 + $0x190] sm:$0xff] }
  0xf8   :  { %1178 = vmatprep.subr.mxu1 %v616_v4  ;;  %913 = vmatprep.mubr.f32.mxu1 %v427_v54  ;;  %v577_v54 = vld [vmem:[#allocation3 + $0x4a8] sm:$0xff]  ;;  %v574_v4 = vld [vmem:[#allocation3 + $0x490] sm:$0xff] }
  0xf9   :  { %1144 = vmatpush3.msra.mxu0 %v472_v59  ;;  %1179 = vmatpush3.msra.mxu1 %v568_v60  ;;  %v529_v58 = vld [vmem:[#allocation3 + $0x328] sm:$0xff]  ;;  %v430_v59 = vld [vmem:[#allocation3 + $0x10] sm:$0xff] }
  0xfa   :  { %1145 = vmatprep.subr.mxu0 %v517_v61  ;;  %1180 = vmatprep.subr.mxu1 %v613_v62  ;;  %v526_v60 = vld [vmem:[#allocation3 + $0x310] sm:$0xff]  ;;  %v953_v61 = vld [vmem:[#allocation6 + $0xf8] sm:$0xff] }
  0xfb   :  { %1146 = vmatpush3.msra.mxu0 %v469_v63  ;;  %1181 = vmatpush3.msra.mxu1 %v565_v0  ;;  %v937_v62 = vld [vmem:[#allocation6 + $0x78] sm:$0xff]  ;;  %v952_v63 = vld [vmem:[#allocation6 + $0xf0] sm:$0xff] }
  0xfc   :  { %1147 = vmatprep.subr.mxu0 %v514_v7  ;;  %1182 = vmatprep.subr.mxu1 %v610_v8  ;;  %v936_v0 = vld [vmem:[#allocation6 + $0x70] sm:$0xff]  ;;  %v951_v7 = vld [vmem:[#allocation6 + $0xe8] sm:$0xff] }
  0xfd   :  { %1148 = vmatpush3.msra.mxu0 %v466_v9  ;;  %1183 = vmatpush3.msra.mxu1 %v562_v10  ;;  %v935_v8 = vld [vmem:[#allocation6 + $0x68] sm:$0xff]  ;;  %v950_v9 = vld [vmem:[#allocation6 + $0xe0] sm:$0xff] }
  0xfe   :  { %1149 = vmatprep.subr.mxu0 %v511_v11  ;;  %1184 = vmatprep.subr.mxu1 %v607_v12  ;;  %v934_v10 = vld [vmem:[#allocation6 + $0x60] sm:$0xff]  ;;  %v949_v11 = vld [vmem:[#allocation6 + $0xd8] sm:$0xff]  ;;  %v931_v12 = vld [vmem:[#allocation6 + $0x48] sm:$0xff] }
  0xff   :  { %1150 = vmatpush3.msra.mxu0 %v463_v13  ;;  %1185 = vmatpush3.msra.mxu1 %v559_v14  ;;  %v946_v13 = vld [vmem:[#allocation6 + $0xc0] sm:$0xff] }
 0x100   :  { %1151 = vmatprep.subr.mxu0 %v508_v15  ;;  %1186 = vmatprep.subr.mxu1 %v604_v16  ;;  %v930_v14 = vld [vmem:[#allocation6 + $0x40] sm:$0xff]  ;;  %v945_v15 = vld [vmem:[#allocation6 + $0xb8] sm:$0xff] }
 0x101   :  { %1152 = vmatpush3.msra.mxu0 %v460_v17  ;;  %1187 = vmatpush3.msra.mxu1 %v556_v18  ;;  %v929_v16 = vld [vmem:[#allocation6 + $0x38] sm:$0xff]  ;;  %v944_v17 = vld [vmem:[#allocation6 + $0xb0] sm:$0xff] }
 0x102   :  { %1153 = vmatprep.subr.mxu0 %v505_v19  ;;  %1188 = vmatprep.subr.mxu1 %v601_v20  ;;  %v928_v18 = vld [vmem:[#allocation6 + $0x30] sm:$0xff]  ;;  %v943_v19 = vld [vmem:[#allocation6 + $0xa8] sm:$0xff] }
 0x103   :  { %1154 = vmatpush3.msra.mxu0 %v457_v21  ;;  %1189 = vmatpush3.msra.mxu1 %v553_v22  ;;  %v927_v20 = vld [vmem:[#allocation6 + $0x28] sm:$0xff]  ;;  %v942_v21 = vld [vmem:[#allocation6 + $0xa0] sm:$0xff] }
 0x104   :  { %1155 = vmatprep.subr.mxu0 %v502_v23  ;;  %1190 = vmatprep.subr.mxu1 %v598_v24  ;;  %v926_v22 = vld [vmem:[#allocation6 + $0x20] sm:$0xff]  ;;  %v941_v23 = vld [vmem:[#allocation6 + $0x98] sm:$0xff] }
 0x105   :  { %1156 = vmatpush3.msra.mxu0 %v454_v25  ;;  %1191 = vmatpush3.msra.mxu1 %v550_v26  ;;  %v925_v24 = vld [vmem:[#allocation6 + $0x18] sm:$0xff]  ;;  %v940_v25 = vld [vmem:[#allocation6 + $0x90] sm:$0xff] }
 0x106   :  { %1157 = vmatprep.subr.mxu0 %v499_v27  ;;  %1192 = vmatprep.subr.mxu1 %v595_v28  ;;  %v924_v26 = vld [vmem:[#allocation6 + $0x10] sm:$0xff]  ;;  %v939_v27 = vld [vmem:[#allocation6 + $0x88] sm:$0xff] }
 0x107   :  { %1158 = vmatpush3.msra.mxu0 %v451_v29  ;;  %1193 = vmatpush3.msra.mxu1 %v547_v30  ;;  %v923_v28 = vld [vmem:[#allocation6 + $0x8] sm:$0xff]  ;;  %v938_v29 = vld [vmem:[#allocation6 + $0x80] sm:$0xff] }
 0x108   :  { %1159 = vmatprep.subr.mxu0 %v496_v31  ;;  %1194 = vmatprep.subr.mxu1 %v592_v32  ;;  %v922_v30 = vld [vmem:[#allocation6] sm:$0xff]  ;;  %v969_v31 = vld [vmem:[#allocation6 + $0x178] sm:$0xff]  ;;  %v968_v32 = vld [vmem:[#allocation6 + $0x170] sm:$0xff] }
 0x109   :  { %1160 = vmatpush3.msra.mxu0 %v448_v33  ;;  %1195 = vmatpush3.msra.mxu1 %v544_v34  ;;  %v967_v33 = vld [vmem:[#allocation6 + $0x168] sm:$0xff]  ;;  %v966_v34 = vld [vmem:[#allocation6 + $0x160] sm:$0xff] }
 0x10a   :  { %1161 = vmatprep.subr.mxu0 %v493_v35  ;;  %1196 = vmatprep.subr.mxu1 %v589_v36  ;;  %v965_v35 = vld [vmem:[#allocation6 + $0x158] sm:$0xff]  ;;  %v964_v36 = vld [vmem:[#allocation6 + $0x150] sm:$0xff] }
 0x10b   :  { %1162 = vmatpush3.msra.mxu0 %v445_v37  ;;  %1197 = vmatpush3.msra.mxu1 %v541_v38  ;;  %v963_v37 = vld [vmem:[#allocation6 + $0x148] sm:$0xff]  ;;  %v962_v38 = vld [vmem:[#allocation6 + $0x140] sm:$0xff] }
 0x10c   :  { %1163 = vmatprep.subr.mxu0 %v490_v39  ;;  %1198 = vmatprep.subr.mxu1 %v586_v40  ;;  %v961_v39 = vld [vmem:[#allocation6 + $0x138] sm:$0xff]  ;;  %v960_v40 = vld [vmem:[#allocation6 + $0x130] sm:$0xff] }
 0x10d   :  { %1164 = vmatpush3.msra.mxu0 %v442_v41  ;;  %1199 = vmatpush3.msra.mxu1 %v538_v42  ;;  %v959_v41 = vld [vmem:[#allocation6 + $0x128] sm:$0xff]  ;;  %v958_v42 = vld [vmem:[#allocation6 + $0x120] sm:$0xff] }
 0x10e   :  { %1165 = vmatprep.subr.mxu0 %v487_v43  ;;  %1200 = vmatprep.subr.mxu1 %v583_v44  ;;  %v957_v43 = vld [vmem:[#allocation6 + $0x118] sm:$0xff]  ;;  %v956_v44 = vld [vmem:[#allocation6 + $0x110] sm:$0xff] }
 0x10f   :  { %1166 = vmatpush3.msra.mxu0 %v439_v45  ;;  %1201 = vmatpush3.msra.mxu1 %v535_v46  ;;  %v955_v45 = vld [vmem:[#allocation6 + $0x108] sm:$0xff]  ;;  %v954_v46 = vld [vmem:[#allocation6 + $0x100] sm:$0xff] }
 0x110   :  { %1167 = vmatprep.subr.mxu0 %v484_v47  ;;  %1202 = vmatprep.subr.mxu1 %v580_v48  ;;  %v620_v47 = vld [vmem:[%s1533_s6] sm:$0x7] }
 0x111   :  { %1168 = vmatpush3.msra.mxu0 %v436_v51  ;;  %1203 = vmatpush3.msra.mxu1 %v532_v52  ;;  %v625_v48 = vrot.slane %v620_v47, %v1449_v5  ;;  %v629_v51 = vrot.slane %v620_v47, %v1445_v3 }
 0x112   :  { %1169 = vmatprep.subr.mxu0 %v481_v53  ;;  %1204 = vmatprep.subr.mxu1 %v577_v54 }
 0x113   :  { %1170 = vmatpush3.msra.mxu0 %v433_v57  ;;  %1205 = vmatpush3.msra.mxu1 %v529_v58 }
 0x114   :  { %1171 = vmatprep.subr.mxu0 %v478_v2  ;;  %1206 = vmatprep.subr.mxu1 %v574_v4 }
 0x115   :  { %1172 = vmatpush3.msra.mxu0 %v430_v59  ;;  %1207 = vmatpush3.msra.mxu1 %v526_v60 }
 0x116   :  { %844 = vmatmul.mubr.f32.vlgmr.msra.gmra.mxu0 %v424_v55  ;;  %914 = vmatmul.mubr.f32.vlgmr.msra.gmra.mxu1 %v426_v56  ;;  %v932_v55 = vld [vmem:[#allocation6 + $0x50] sm:$0xff]  ;;  %v947_v56 = vld [vmem:[#allocation6 + $0xc8] sm:$0xff] }
 0x117   :  { %1211 = vmatprep.subr.mxu0 %v953_v61  ;;  %1263 = vmatprep.subr.mxu1 %v1381_v1 }
 0x118   :  { %1212 = vmatpush3.msra.mxu0 %v937_v62  ;;  %1264 = vmatpush3.msra.mxu1 %v969_v31 }
 0x119   :  { %1213 = vmatprep.subr.mxu0 %v952_v63  ;;  %1265 = vmatprep.subr.mxu1 %v1381_v1  ;;  %v633_v63 = vrot.slane %v620_v47, %v1452_v6 }
 0x11a   :  { %1214 = vmatpush3.msra.mxu0 %v936_v0  ;;  %1266 = vmatpush3.msra.mxu1 %v968_v32 }
 0x11b   :  { %1215 = vmatprep.subr.mxu0 %v951_v7  ;;  %1267 = vmatprep.subr.mxu1 %v1381_v1 }
 0x11c   :  { %1216 = vmatpush3.msra.mxu0 %v935_v8  ;;  %1268 = vmatpush3.msra.mxu1 %v967_v33 }
 0x11d   :  { %1217 = vmatprep.subr.mxu0 %v950_v9  ;;  %1269 = vmatprep.subr.mxu1 %v1381_v1 }
 0x11e   :  { %1218 = vmatpush3.msra.mxu0 %v934_v10  ;;  %1270 = vmatpush3.msra.mxu1 %v966_v34 }
 0x11f   :  { %1219 = vmatprep.subr.mxu0 %v949_v11  ;;  %1271 = vmatprep.subr.mxu1 %v1381_v1 }
 0x120   :  { %1220 = vmatpush3.msra.mxu0 %v933_v49  ;;  %1272 = vmatpush3.msra.mxu1 %v965_v35 }
 0x121   :  { %1221 = vmatprep.subr.mxu0 %v948_v50  ;;  %1273 = vmatprep.subr.mxu1 %v1381_v1 }
 0x122   :  { %1222 = vmatpush3.msra.mxu0 %v932_v55  ;;  %1274 = vmatpush3.msra.mxu1 %v964_v36  ;;  %v971_v55 = vstv %s1535_s8 }
 0x123   :  { %1223 = vmatprep.subr.mxu0 %v947_v56  ;;  %1275 = vmatprep.subr.mxu1 %v1381_v1 }
 0x124   :  { %1224 = vmatpush3.msra.mxu0 %v931_v12  ;;  %1276 = vmatpush3.msra.mxu1 %v963_v37 }
 0x125   :  { %1225 = vmatprep.subr.mxu0 %v946_v13  ;;  %1277 = vmatprep.subr.mxu1 %v1381_v1 }
 0x126   :  { %1226 = vmatpush3.msra.mxu0 %v930_v14  ;;  %1278 = vmatpush3.msra.mxu1 %v962_v38 }
 0x127   :  { %1227 = vmatprep.subr.mxu0 %v945_v15  ;;  %1279 = vmatprep.subr.mxu1 %v1381_v1 }
 0x128   :  { %1228 = vmatpush3.msra.mxu0 %v929_v16  ;;  %1280 = vmatpush3.msra.mxu1 %v961_v39 }
 0x129   :  { %1229 = vmatprep.subr.mxu0 %v944_v17  ;;  %1281 = vmatprep.subr.mxu1 %v1381_v1 }
 0x12a   :  { %1230 = vmatpush3.msra.mxu0 %v928_v18  ;;  %1282 = vmatpush3.msra.mxu1 %v960_v40 }
 0x12b   :  { %1231 = vmatprep.subr.mxu0 %v943_v19  ;;  %1283 = vmatprep.subr.mxu1 %v1381_v1 }
 0x12c   :  { %1232 = vmatpush3.msra.mxu0 %v927_v20  ;;  %1284 = vmatpush3.msra.mxu1 %v959_v41 }
 0x12d   :  { %1233 = vmatprep.subr.mxu0 %v942_v21  ;;  %1285 = vmatprep.subr.mxu1 %v1381_v1 }
 0x12e   :  { %1234 = vmatpush3.msra.mxu0 %v926_v22  ;;  %1286 = vmatpush3.msra.mxu1 %v958_v42 }
 0x12f   :  { %1235 = vmatprep.subr.mxu0 %v941_v23  ;;  %1287 = vmatprep.subr.mxu1 %v1381_v1 }
 0x130   :  { %1236 = vmatpush3.msra.mxu0 %v925_v24  ;;  %1288 = vmatpush3.msra.mxu1 %v957_v43 }
 0x131   :  { %1237 = vmatprep.subr.mxu0 %v940_v25  ;;  %1289 = vmatprep.subr.mxu1 %v1381_v1 }
 0x132   :  { %1238 = vmatpush3.msra.mxu0 %v924_v26  ;;  %1290 = vmatpush3.msra.mxu1 %v956_v44 }
 0x133   :  { %1239 = vmatprep.subr.mxu0 %v939_v27  ;;  %1291 = vmatprep.subr.mxu1 %v1381_v1 }
 0x134   :  { %1240 = vmatpush3.msra.mxu0 %v923_v28  ;;  %1292 = vmatpush3.msra.mxu1 %v955_v45 }
 0x135   :  { %1241 = vmatprep.subr.mxu0 %v938_v29  ;;  %1293 = vmatprep.subr.mxu1 %v1381_v1 }
 0x136   :  { %1242 = vmatpush3.msra.mxu0 %v922_v30  ;;  %1294 = vmatpush3.msra.mxu1 %v954_v46 }
 0x137   :  { %1295 = vmatprep.mubr.msk.f32.mxu1 %vm1382_vm4, %v1381_v1 }
 0x1b5   :  { %v703_v52 = vpop.f32.mrf.mxu0  ;;  %v774_v53 = vpop.f32.mrf.mxu1 }
 0x1b6   :  { %v704_v54 = vadd.f32 %v703_v52, %v625_v48 }
 0x1b7   :  { %v705_v57 = vpop.f32.mrf.mxu0  ;;  %v776_v4 = vpop.f32.mrf.mxu1 }
 0x1b8   :  { %v706_v58 = vadd.f32 %v705_v57, %v629_v51  ;;  %v775_v2 = vadd.f32 %v774_v53, %v704_v54 }
 0x1ba   :  { %v777_v59 = vadd.f32 %v776_v4, %v706_v58  ;;  %v919_v61 = vmax.f32 %v775_v2, 0.0 }
 0x1bc   :  { %v920_v60 = vmax.f32 %v777_v59, 0.0 }
 0x1be   :  { %1036 = vmatprep.mubr.f32.mxu0 %v920_v60 }
 0x1bf   :  { %1037 = vmatmul.mubr.f32.vlgmr.msra.gmra.mxu0 %v919_v61 }
 0x1d6   :  { %v1173_v1 = vpop.f32.mrf.mxu0  ;;  %v1208_v62 = vpop.f32.mrf.mxu1 }
 0x1d8   :  { %v1174_v0 = vpop.f32.mrf.mxu0  ;;  %v1209_v5 = vpop.f32.mrf.mxu1 }
 0x1d9   :  { %v1175_v7 = vadd.f32 %v1174_v0, %v1173_v1  ;;  %v1210_v8 = vadd.f32 %v1209_v5, %v1208_v62 }
 0x1db   :  { %v846_v3 = vadd.f32 %v1175_v7, %v633_v63 }
 0x1dd   :  { %v916_v9 = vadd.f32 %v1210_v8, %v846_v3 }
 0x1df   :  { %v921_v10 = vmax.f32 %v916_v9, 0.0 }
 0x1e1   :  { %1296 = vmatmul.mubr.f32.vlgmr.msra.gmra.mxu1 %v921_v10 }
 0x27f   :  { %v1243_v11 = vpop.f32.mrf.mxu0 }
 0x281   :  { %v1244_v49 = vpop.f32.mrf.mxu0 }
 0x282   :  { %v1245_v50 = vadd.f32 %v1244_v49, %v1243_v11 }
 0x284   :  { %v1039_v56 = vadd.f32 %v1245_v50, %v971_v55 }
 0x2a1   :  { %v1108_v12 = vpop.f32.mrf.mxu1 }
 0x2a2   :  { %v1109_v6 = vadd.f32 %v1108_v12, %v1039_v56 }
 0x2a3   :  { %v1297_v13 = vpop.f32.mrf.mxu1 }
 0x2a4   :  { %1112 = vst [vmem:[#allocation8] sm:$0xff] %v1109_v6 }
 0x2a5   :  { %1360 = shalt.err (!%p1357_p0)
}
 0x2a6   :  { %1122 = dma.vmem_to_hbm [thread:$0]  %s1120_s11, 128, %s1536_s9, [#allocation5]  }
 0x2a7   :  { %1373 = dma.done.wait [#allocation5], 128  }
 0x2a8   :  { %1374 = vsyncadd [#allocation5], 4294967168 }
 0x2a9   :  { %1126 = vsyncpa [#allocation4], 1 }
 0x2aa   :  { %1127 = vsyncpa [#allocation7], 1 }
 0x2ab   :  { %1128 = vsyncpa [#allocation5], 1 }

</bundles_post_ra>
